<compile_context>
chip_gen: v7x
topology: tpu7x:2x2x1
jax: 0.10.0
libtpu: 0.0.40
codegen_flags: <defaults>
</compile_context>

<pallas_src>
import jax
import jax.numpy as jnp
import numpy as np
from jax import lax
from jax.experimental import pallas as pl
from jax.experimental.pallas import tpu as pltpu


# Set to jnp.bfloat16 on v6e/v7x for ~2x MXU throughput (accumulation stays f32;
# loosen the test tolerance to ~2e-2 when doing so).  Kept f32 here so the
# strict reference check below passes on every generation (v5e has no bf16 VPU).
MXU_DTYPE = jnp.float32


def _round_up(x, m):
    return ((x + m - 1) // m) * m


def _pad_rows(x, n_to, fill):
    n = x.shape[0]
    if n == n_to:
        return x
    pad = jnp.full((n_to - n,) + x.shape[1:], fill, dtype=x.dtype)
    return jnp.concatenate([x, pad], axis=0)


# ----------------------------------------------------------------------------
# Fused GNN stack + first-dense kernel: runs ALL GnnLayers for BOTH proteins and
# projects straight into the pair-MLP's first hidden space in one call.
#   layer:  relu(H @ Wr + (adj @ (H @ Wnr)) * (1 / #valid_neighbors))
#   head:   g1 = H1 @ W0a            g2 = H2 @ W0b + b0
# ----------------------------------------------------------------------------
def make_gnn_head_kernel(num_layers):
    def kernel(*refs):
        z1_ref, nbr1_ref, z2_ref, nbr2_ref = refs[:4]
        w_refs = refs[4:4 + 2 * num_layers]
        w0a_ref, w0b_ref, b0_ref = refs[4 + 2 * num_layers:4 + 2 * num_layers + 3]
        g1_ref, g2_ref = refs[4 + 2 * num_layers + 3:]

        def run_protein(z_ref, nbr_ref, w0_ref, bias, out_ref):
            nbr = nbr_ref[...]                                  # (N, K) i32
            n, k = nbr.shape
            # adj[i, j] = #{kk : neighbors[i, kk] == j}.  The -1 "no neighbor"
            # sentinel never matches a column index (iota >= 0), so no extra
            # mask is needed.  Built ONCE and reused by every layer.
            col = lax.broadcasted_iota(jnp.int32, (n, n), 1)
            adj = jnp.zeros((n, n), jnp.float32)
            for kk in range(k):                                 # K small & static
                adj = adj + (nbr[:, kk:kk + 1] == col).astype(jnp.float32)
            cnt = jnp.sum((nbr > -1).astype(jnp.float32), axis=1, keepdims=True)
            inv_norm = 1.0 / jnp.where(cnt == 0.0, 1.0, cnt)    # divide hoisted out of layer loop
            adj_m = adj.astype(MXU_DTYPE)

            h = z_ref[...]
            for l in range(num_layers):                         # few, static layers
                wr = w_refs[2 * l][...].astype(MXU_DTYPE)
                wnr = w_refs[2 * l + 1][...].astype(MXU_DTYPE)
                hm = h.astype(MXU_DTYPE)
                res_sig = jnp.dot(hm, wr, preferred_element_type=jnp.float32)
                nb_sig = jnp.dot(hm, wnr, preferred_element_type=jnp.float32)
                agg = jnp.dot(adj_m, nb_sig.astype(MXU_DTYPE),
                              preferred_element_type=jnp.float32)
                h = jnp.maximum(res_sig + agg * inv_norm, 0.0)  # relu

            # Fold in the first (split) Linear of the pair head.
            g = jnp.dot(h.astype(MXU_DTYPE), w0_ref[...].astype(MXU_DTYPE),
                        preferred_element_type=jnp.float32)
            if bias is not None:
                g = g + bias
            out_ref[...] = g

        run_protein(z1_ref, nbr1_ref, w0a_ref, None, g1_ref)
        run_protein(z2_ref, nbr2_ref, w0b_ref, b0_ref[...], g2_ref)

    return kernel


def gnn_stack_with_head(z1, nbr1, z2, nbr2, conv_weights, w0a, w0b, b0):
    n1 = z1.shape[0]
    n2 = z2.shape[0]
    d0 = w0a.shape[1]
    flat_w = [w for pair in conv_weights for w in pair] + [w0a, w0b, b0]

    in_specs = [pl.BlockSpec(z1.shape, lambda i: (0, 0)),
                pl.BlockSpec(nbr1.shape, lambda i: (0, 0)),
                pl.BlockSpec(z2.shape, lambda i: (0, 0)),
                pl.BlockSpec(nbr2.shape, lambda i: (0, 0))]
    in_specs += [pl.BlockSpec(w.shape, lambda i: (0, 0)) for w in flat_w]

    return pl.pallas_call(
        make_gnn_head_kernel(len(conv_weights)),
        out_shape=(jax.ShapeDtypeStruct((n1, d0), jnp.float32),
                   jax.ShapeDtypeStruct((n2, d0), jnp.float32)),
        grid=(1,),
        in_specs=in_specs,
        out_specs=(pl.BlockSpec((n1, d0), lambda i: (0, 0)),
                   pl.BlockSpec((n2, d0), lambda i: (0, 0))),
        compiler_params=pltpu.CompilerParams(
            dimension_semantics=("arbitrary",),
            vmem_limit_bytes=32 * 1024 * 1024),
    )(z1, nbr1, z2, nbr2, *flat_w)


# ----------------------------------------------------------------------------
# Pairwise dense (NoConv) tail kernel, row-tiled over protein 1.
# g1/g2 already carry the first Linear's signal, so each grid step only does:
#   relu(g1_i + g2_j)  ->  hidden Linear+ReLU stack  ->  Linear(.,1)+sigmoid,
# batching TILE_M * N2 pair rows per step as full MXU matmuls and storing a
# lane-dense (TILE_M, N2) slab.
# ----------------------------------------------------------------------------
def make_pair_mlp_kernel(num_hidden):
    def kernel(*refs):
        g1_ref, g2_ref = refs[0], refs[1]
        out_ref = refs[-1]                                       # (TILE_M, N2p) lane-dense
        w = refs[2:-1]                                           # (Wk, bk)*, Wl_row, bl

        tm, d0 = g1_ref.shape
        n2 = g2_ref.shape[0]

        x = jnp.maximum(g1_ref[...][:, None, :] + g2_ref[...][None, :, :], 0.0)  # (TM, N2, d0)
        x = x.reshape(tm * n2, d0)                               # batched pair rows (MXU M dim)

        idx = 0
        for _ in range(num_hidden - 1):
            wk = w[idx][...].astype(MXU_DTYPE)
            bk = w[idx + 1][...]
            x = jnp.maximum(jnp.dot(x.astype(MXU_DTYPE), wk,
                                    preferred_element_type=jnp.float32) + bk, 0.0)
            idx += 2

        # Final Linear(d_last, 1) + sigmoid as multiply + lane-reduce so the
        # output slab stays lane-dense (TM, N2) instead of (TM*N2, 1).
        wl_row = w[idx][...]                                     # (1, d_last) (pre-transposed)
        bl = w[idx + 1][...]                                     # (1, 1)
        d_last = wl_row.shape[1]
        x3 = x.reshape(tm, n2, d_last)
        y = jnp.sum(x3 * wl_row.reshape(1, 1, d_last), axis=-1) + bl   # (TM, N2)
        out_ref[...] = jax.nn.sigmoid(y)

    return kernel


def pair_mlp(g1p, g2p, tail_weights, num_hidden, tile_m, n1, n2):
    n1p, d0 = g1p.shape
    n2p = g2p.shape[0]
    n_steps = n1p // tile_m
    rows = n1p * n2p

    # Pre-transpose the last weight to a lane row outside the kernel.
    kw = list(tail_weights)
    kw[-2] = tail_weights[-2].T                                  # (d_last, 1) -> (1, d_last)

    # Advisory cost estimate so XLA schedules around the call sensibly.
    flops = 2 * rows * d0                                        # add + relu of the split Linear
    idx = 0
    while idx < len(kw) - 2:
        din, dout = kw[idx].shape
        flops += 2 * rows * din * dout
        idx += 2
    flops += 2 * rows * kw[-2].shape[1]
    bytes_accessed = 4 * (g1p.size + n_steps * g2p.size
                          + n_steps * sum(int(w.size) for w in kw) + rows)
    ce = pl.CostEstimate(flops=int(flops), transcendentals=int(rows),
                         bytes_accessed=int(bytes_accessed))

    in_specs = [pl.BlockSpec((tile_m, d0), lambda i: (i, 0)),
                pl.BlockSpec((n2p, d0), lambda i: (0, 0))]
    in_specs += [pl.BlockSpec(w.shape, lambda i: (0, 0)) for w in kw]

    out = pl.pallas_call(
        make_pair_mlp_kernel(num_hidden),
        out_shape=jax.ShapeDtypeStruct((n1p, n2p), jnp.float32),
        grid=(n_steps,),
        in_specs=in_specs,
        out_specs=pl.BlockSpec((tile_m, n2p), lambda i: (i, 0)),
        compiler_params=pltpu.CompilerParams(
            dimension_semantics=("parallel",),       # megacore-shardable on v7x
            vmem_limit_bytes=32 * 1024 * 1024),
        cost_estimate=ce,
    )(g1p, g2p, *kw)

    # torch: stack([cat(p) for p in product(x1, x2)]) -> row i*N2 + j, then squeeze.
    return out[:n1, :n2].reshape(n1 * n2)


# ----------------------------------------------------------------------------
# ResiduesNetwork wrapper (parameter setup + padding glue in plain JAX)
# ----------------------------------------------------------------------------
class ResiduesNetworkPallas:
    def __init__(self, conv_filters, dense_filters, bert, key):
        v_feats = 1024 if bert else 24   # TODO(synk): len(CATEGORIES['residues']) assumed 24
        self.conv_filters = list(conv_filters)
        self.dense_filters = list(dense_filters)

        # ResiduesGnn layer dims (matches the module's chaining logic).
        dims = [(v_feats, conv_filters[0])]
        dims += list(zip(conv_filters[:-1], conv_filters[1:]))

        keys = jax.random.split(key, 2 * len(dims) + 2 * (len(dense_filters) + 1) + 2)
        kit = iter(keys)

        self.conv_weights = []
        for fin, fout in dims:
            wr = 0.3 * jax.random.normal(next(kit), (fin, fout), jnp.float32)
            wnr = 0.3 * jax.random.normal(next(kit), (fin, fout), jnp.float32)
            self.conv_weights.append((wr, wnr))

        # NoConv: Linear(2F, d0)+ReLU, [Linear(d_{k-1}, d_k)+ReLU]..., Linear(d_last,1)+Sigmoid
        f = conv_filters[-1]
        d0 = dense_filters[0]
        w0a = 0.3 * jax.random.normal(next(kit), (f, d0), jnp.float32)
        w0b = 0.3 * jax.random.normal(next(kit), (f, d0), jnp.float32)
        b0 = 0.1 * jax.random.normal(next(kit), (1, d0), jnp.float32)
        mlp = [w0a, w0b, b0]
        for din, dout in zip(dense_filters[:-1], dense_filters[1:]):
            mlp.append(0.3 * jax.random.normal(next(kit), (din, dout), jnp.float32))
            mlp.append(0.1 * jax.random.normal(next(kit), (1, dout), jnp.float32))
        mlp.append(0.3 * jax.random.normal(next(kit), (dense_filters[-1], 1), jnp.float32))
        mlp.append(0.1 * jax.random.normal(next(kit), (1, 1), jnp.float32))
        self.mlp_weights = mlp

    def forward(self, xdata):
        (z1, nbr1), (z2, nbr2) = xdata
        n1, n2 = z1.shape[0], z2.shape[0]

        # Pick the pair-MLP row tile so TILE_M * N2p is an MXU-friendly M dim,
        # then pad residue counts (N2 to sublane multiple 8, N1 to TILE_M mult).
        n2p = _round_up(n2, 8)
        tile_m = max(8, min(128,
                            max(8, (256 // n2p) // 8 * 8),
                            _round_up(n1, 8)))
        n1p = _round_up(n1, tile_m)

        z1p = _pad_rows(z1, n1p, 0.0)
        z2p = _pad_rows(z2, n2p, 0.0)
        nbr1p = _pad_rows(nbr1, n1p, -1)
        nbr2p = _pad_rows(nbr2, n2p, -1)

        w0a, w0b, b0 = self.mlp_weights[:3]
        tail = self.mlp_weights[3:]

        g1p, g2p = gnn_stack_with_head(z1p, nbr1p, z2p, nbr2p,
                                       self.conv_weights, w0a, w0b, b0)
        return pair_mlp(g1p, g2p, tail, len(self.dense_filters),
                        tile_m, n1, n2)


# ----------------------------------------------------------------------------
# Pure-JAX reference (for correctness check)
# ----------------------------------------------------------------------------
def ref_gnn_layer(z, nbr, wr, wnr):
    res = z @ wr
    nbs = z @ wnr
    valid = nbr > -1
    gathered = nbs[jnp.where(valid, nbr, 0)] * valid[:, :, None].astype(jnp.float32)
    cnt = valid.sum(axis=1, keepdims=True).astype(jnp.float32)
    norm = jnp.where(cnt == 0.0, 1.0, cnt)
    return jax.nn.relu(res + gathered.sum(axis=1) / norm)


def ref_forward(model, xdata):
    (z1, nbr1), (z2, nbr2) = xdata
    h1, h2 = z1, z2
    for wr, wnr in model.conv_weights:
        h1 = ref_gnn_layer(h1, nbr1, wr, wnr)
        h2 = ref_gnn_layer(h2, nbr2, wr, wnr)
    n1, n2 = h1.shape[0], h2.shape[0]
    pairs = jnp.concatenate(
        [jnp.repeat(h1, n2, axis=0), jnp.tile(h2, (n1, 1))], axis=1)
    w = model.mlp_weights
    w0 = jnp.concatenate([w[0], w[1]], axis=0)
    x = jax.nn.relu(pairs @ w0 + w[2])
    idx = 3
    for _ in range(len(model.dense_filters) - 1):
        x = jax.nn.relu(x @ w[idx] + w[idx + 1])
        idx += 2
    y = jax.nn.sigmoid(x @ w[idx] + w[idx + 1])
    return y[:, 0]


# ----------------------------------------------------------------------------
if __name__ == "__main__":
    key = jax.random.PRNGKey(0)
    k1, k2, k3, k4, kmodel = jax.random.split(key, 5)

    # Small, deterministic shapes: protein A has 24 residues, protein B has 13
    # (exercises row padding + a 2-step parallel grid); K=4 neighbors; 24
    # residue-category features (bert=False).
    N1, N2, K, V = 24, 13, 4, 24
    z1 = jax.random.normal(k1, (N1, V), dtype=jnp.float32)
    z2 = jax.random.normal(k2, (N2, V), dtype=jnp.float32)
    nbr1 = jax.random.randint(k3, (N1, K), -1, N1, dtype=jnp.int32)
    nbr2 = jax.random.randint(k4, (N2, K), -1, N2, dtype=jnp.int32)
    nbr1 = nbr1.at[0].set(-1)   # exercise the "no valid neighbor" normalisation path

    conv_filters = [16, 16]
    dense_filters = [32, 16]
    model = ResiduesNetworkPallas(conv_filters, dense_filters, bert=False, key=kmodel)

    xdata = ((z1, nbr1), (z2, nbr2))
    out = jax.block_until_ready(model.forward(xdata))
    ref = jax.block_until_ready(ref_forward(model, xdata))

    assert out.shape == (N1 * N2,), out.shape
    tol = 1e-4 if MXU_DTYPE == jnp.float32 else 2e-2
    np.testing.assert_allclose(np.asarray(out), np.asarray(ref), rtol=tol, atol=tol)

    print("KERNEL_OK")
</pallas_src>

<mosaic_0001>
module attributes {stable_mosaic.version = 11 : i64} {
  func.func @kernel(%arg0: i32, %arg1: memref<32x24xf32, #tpu.memory_space<vmem>>, %arg2: memref<32x4xi32, #tpu.memory_space<vmem>>, %arg3: memref<16x24xf32, #tpu.memory_space<vmem>>, %arg4: memref<16x4xi32, #tpu.memory_space<vmem>>, %arg5: memref<24x16xf32, #tpu.memory_space<vmem>>, %arg6: memref<24x16xf32, #tpu.memory_space<vmem>>, %arg7: memref<16x16xf32, #tpu.memory_space<vmem>>, %arg8: memref<16x16xf32, #tpu.memory_space<vmem>>, %arg9: memref<16x32xf32, #tpu.memory_space<vmem>>, %arg10: memref<16x32xf32, #tpu.memory_space<vmem>>, %arg11: memref<1x32xf32, #tpu.memory_space<vmem>>, %arg12: memref<32x32xf32, #tpu.memory_space<vmem>>, %arg13: memref<16x32xf32, #tpu.memory_space<vmem>>) attributes {dimension_semantics = [#tpu.dimension_semantics<arbitrary>], iteration_bounds = array<i64: 1>, scalar_prefetch = 0 : i64, scratch_operands = 0 : i64, tpu.core_type = #tpu.core_type<tc>, window_params = [{pipeline_mode = #tpu.pipeline_mode<synchronous>, transform_indices = @transform_0, window_bounds = array<i64: 32, 24>}, {pipeline_mode = #tpu.pipeline_mode<synchronous>, transform_indices = @transform_1, window_bounds = array<i64: 32, 4>}, {pipeline_mode = #tpu.pipeline_mode<synchronous>, transform_indices = @transform_2, window_bounds = array<i64: 16, 24>}, {pipeline_mode = #tpu.pipeline_mode<synchronous>, transform_indices = @transform_3, window_bounds = array<i64: 16, 4>}, {pipeline_mode = #tpu.pipeline_mode<synchronous>, transform_indices = @transform_4, window_bounds = array<i64: 24, 16>}, {pipeline_mode = #tpu.pipeline_mode<synchronous>, transform_indices = @transform_5, window_bounds = array<i64: 24, 16>}, {pipeline_mode = #tpu.pipeline_mode<synchronous>, transform_indices = @transform_6, window_bounds = array<i64: 16, 16>}, {pipeline_mode = #tpu.pipeline_mode<synchronous>, transform_indices = @transform_7, window_bounds = array<i64: 16, 16>}, {pipeline_mode = #tpu.pipeline_mode<synchronous>, transform_indices = @transform_8, window_bounds = array<i64: 16, 32>}, {pipeline_mode = #tpu.pipeline_mode<synchronous>, transform_indices = @transform_9, window_bounds = array<i64: 16, 32>}, {pipeline_mode = #tpu.pipeline_mode<synchronous>, transform_indices = @transform_10, window_bounds = array<i64: 1, 32>}, {pipeline_mode = #tpu.pipeline_mode<synchronous>, transform_indices = @transform_11, window_bounds = array<i64: 32, 32>}, {pipeline_mode = #tpu.pipeline_mode<synchronous>, transform_indices = @transform_12, window_bounds = array<i64: 16, 32>}]} {
    %c0 = arith.constant 0 : index
    %c0_0 = arith.constant 0 : index
    %0 = vector.load %arg2[%c0, %c0_0] : memref<32x4xi32, #tpu.memory_space<vmem>>, vector<32x4xi32>
    %1 = tpu.iota {dimensions = array<i32: 1>} : vector<32x32xi32>
    %cst = arith.constant 0.000000e+00 : f32
    %2 = vector.broadcast %cst : f32 to vector<32x32xf32>
    %3 = vector.extract_strided_slice %0 {offsets = [0, 0], sizes = [32, 1], strides = [1, 1]} : vector<32x4xi32> to vector<32x1xi32>
    %4 = vector.broadcast %3 : vector<32x1xi32> to vector<32x32xi32>
    %5 = arith.cmpi eq, %4, %1 : vector<32x32xi32>
    %6 = arith.extui %5 : vector<32x32xi1> to vector<32x32xi32>
    %7 = arith.sitofp %6 : vector<32x32xi32> to vector<32x32xf32>
    %8 = arith.addf %2, %7 : vector<32x32xf32>
    %9 = vector.extract_strided_slice %0 {offsets = [0, 1], sizes = [32, 1], strides = [1, 1]} : vector<32x4xi32> to vector<32x1xi32>
    %10 = vector.broadcast %9 : vector<32x1xi32> to vector<32x32xi32>
    %11 = arith.cmpi eq, %10, %1 : vector<32x32xi32>
    %12 = arith.extui %11 : vector<32x32xi1> to vector<32x32xi32>
    %13 = arith.sitofp %12 : vector<32x32xi32> to vector<32x32xf32>
    %14 = arith.addf %8, %13 : vector<32x32xf32>
    %15 = vector.extract_strided_slice %0 {offsets = [0, 2], sizes = [32, 1], strides = [1, 1]} : vector<32x4xi32> to vector<32x1xi32>
    %16 = vector.broadcast %15 : vector<32x1xi32> to vector<32x32xi32>
    %17 = arith.cmpi eq, %16, %1 : vector<32x32xi32>
    %18 = arith.extui %17 : vector<32x32xi1> to vector<32x32xi32>
    %19 = arith.sitofp %18 : vector<32x32xi32> to vector<32x32xf32>
    %20 = arith.addf %14, %19 : vector<32x32xf32>
    %21 = vector.extract_strided_slice %0 {offsets = [0, 3], sizes = [32, 1], strides = [1, 1]} : vector<32x4xi32> to vector<32x1xi32>
    %22 = vector.broadcast %21 : vector<32x1xi32> to vector<32x32xi32>
    %23 = arith.cmpi eq, %22, %1 : vector<32x32xi32>
    %24 = arith.extui %23 : vector<32x32xi1> to vector<32x32xi32>
    %25 = arith.sitofp %24 : vector<32x32xi32> to vector<32x32xf32>
    %26 = arith.addf %20, %25 : vector<32x32xf32>
    %c-1_i32 = arith.constant -1 : i32
    %27 = vector.broadcast %c-1_i32 : i32 to vector<32x4xi32>
    %28 = arith.cmpi sgt, %0, %27 : vector<32x4xi32>
    %29 = arith.extui %28 : vector<32x4xi1> to vector<32x4xi32>
    %30 = arith.sitofp %29 : vector<32x4xi32> to vector<32x4xf32>
    %cst_1 = arith.constant dense<0.000000e+00> : vector<32xf32>
    %31 = vector.multi_reduction <add>, %30, %cst_1 [1] : vector<32x4xf32> to vector<32xf32>
    %32 = vector.shape_cast %31 : vector<32xf32> to vector<32x1xf32>
    %cst_2 = arith.constant 0.000000e+00 : f32
    %33 = vector.broadcast %cst_2 : f32 to vector<32x1xf32>
    %34 = arith.cmpf oeq, %32, %33 : vector<32x1xf32>
    %cst_3 = arith.constant 1.000000e+00 : f32
    %35 = vector.broadcast %cst_3 : f32 to vector<32x1xf32>
    %36 = arith.select %34, %35, %32 : vector<32x1xi1>, vector<32x1xf32>
    %cst_4 = arith.constant 1.000000e+00 : f32
    %37 = vector.broadcast %cst_4 : f32 to vector<32x1xf32>
    %38 = arith.divf %37, %36 : vector<32x1xf32>
    %c0_5 = arith.constant 0 : index
    %c0_6 = arith.constant 0 : index
    %39 = vector.load %arg1[%c0_5, %c0_6] : memref<32x24xf32, #tpu.memory_space<vmem>>, vector<32x24xf32>
    %c0_7 = arith.constant 0 : index
    %c0_8 = arith.constant 0 : index
    %40 = vector.load %arg5[%c0_7, %c0_8] : memref<24x16xf32, #tpu.memory_space<vmem>>, vector<24x16xf32>
    %c0_9 = arith.constant 0 : index
    %c0_10 = arith.constant 0 : index
    %41 = vector.load %arg6[%c0_9, %c0_10] : memref<24x16xf32, #tpu.memory_space<vmem>>, vector<24x16xf32>
    %cst_11 = arith.constant dense<0.000000e+00> : vector<32x16xf32>
    %42 = tpu.matmul %39, %40, %cst_11 {dimension_numbers = #tpu.dot_dimension_numbers<[1], [0], [0], [1], [0, 0, 1, 1], [], []>} : vector<32x24xf32>, vector<24x16xf32>, vector<32x16xf32> -> vector<32x16xf32>
    %cst_12 = arith.constant dense<0.000000e+00> : vector<32x16xf32>
    %43 = tpu.matmul %39, %41, %cst_12 {dimension_numbers = #tpu.dot_dimension_numbers<[1], [0], [0], [1], [0, 0, 1, 1], [], []>} : vector<32x24xf32>, vector<24x16xf32>, vector<32x16xf32> -> vector<32x16xf32>
    %cst_13 = arith.constant dense<0.000000e+00> : vector<32x16xf32>
    %44 = tpu.matmul %26, %43, %cst_13 {dimension_numbers = #tpu.dot_dimension_numbers<[1], [0], [0], [1], [0, 0, 1, 1], [], []>} : vector<32x32xf32>, vector<32x16xf32>, vector<32x16xf32> -> vector<32x16xf32>
    %45 = vector.broadcast %38 : vector<32x1xf32> to vector<32x16xf32>
    %46 = arith.mulf %44, %45 : vector<32x16xf32>
    %47 = arith.addf %42, %46 : vector<32x16xf32>
    %cst_14 = arith.constant 0.000000e+00 : f32
    %48 = vector.broadcast %cst_14 : f32 to vector<32x16xf32>
    %49 = arith.maximumf %47, %48 : vector<32x16xf32>
    %c0_15 = arith.constant 0 : index
    %c0_16 = arith.constant 0 : index
    %50 = vector.load %arg7[%c0_15, %c0_16] : memref<16x16xf32, #tpu.memory_space<vmem>>, vector<16x16xf32>
    %c0_17 = arith.constant 0 : index
    %c0_18 = arith.constant 0 : index
    %51 = vector.load %arg8[%c0_17, %c0_18] : memref<16x16xf32, #tpu.memory_space<vmem>>, vector<16x16xf32>
    %cst_19 = arith.constant dense<0.000000e+00> : vector<32x16xf32>
    %52 = tpu.matmul %49, %50, %cst_19 {dimension_numbers = #tpu.dot_dimension_numbers<[1], [0], [0], [1], [0, 0, 1, 1], [], []>} : vector<32x16xf32>, vector<16x16xf32>, vector<32x16xf32> -> vector<32x16xf32>
    %cst_20 = arith.constant dense<0.000000e+00> : vector<32x16xf32>
    %53 = tpu.matmul %49, %51, %cst_20 {dimension_numbers = #tpu.dot_dimension_numbers<[1], [0], [0], [1], [0, 0, 1, 1], [], []>} : vector<32x16xf32>, vector<16x16xf32>, vector<32x16xf32> -> vector<32x16xf32>
    %cst_21 = arith.constant dense<0.000000e+00> : vector<32x16xf32>
    %54 = tpu.matmul %26, %53, %cst_21 {dimension_numbers = #tpu.dot_dimension_numbers<[1], [0], [0], [1], [0, 0, 1, 1], [], []>} : vector<32x32xf32>, vector<32x16xf32>, vector<32x16xf32> -> vector<32x16xf32>
    %55 = vector.broadcast %38 : vector<32x1xf32> to vector<32x16xf32>
    %56 = arith.mulf %54, %55 : vector<32x16xf32>
    %57 = arith.addf %52, %56 : vector<32x16xf32>
    %cst_22 = arith.constant 0.000000e+00 : f32
    %58 = vector.broadcast %cst_22 : f32 to vector<32x16xf32>
    %59 = arith.maximumf %57, %58 : vector<32x16xf32>
    %c0_23 = arith.constant 0 : index
    %c0_24 = arith.constant 0 : index
    %60 = vector.load %arg9[%c0_23, %c0_24] : memref<16x32xf32, #tpu.memory_space<vmem>>, vector<16x32xf32>
    %cst_25 = arith.constant dense<0.000000e+00> : vector<32x32xf32>
    %61 = tpu.matmul %59, %60, %cst_25 {dimension_numbers = #tpu.dot_dimension_numbers<[1], [0], [0], [1], [0, 0, 1, 1], [], []>} : vector<32x16xf32>, vector<16x32xf32>, vector<32x32xf32> -> vector<32x32xf32>
    %c0_26 = arith.constant 0 : index
    %c0_27 = arith.constant 0 : index
    %62 = vector.load %arg12[%c0_26, %c0_27] : memref<32x32xf32, #tpu.memory_space<vmem>>, vector<32x32xf32>
    tpu.vector_store %arg12[%c0_26, %c0_27], %61 {strides = array<i32>} : memref<32x32xf32, #tpu.memory_space<vmem>>, vector<32x32xf32>,
    %c0_28 = arith.constant 0 : index
    %c0_29 = arith.constant 0 : index
    %63 = vector.load %arg11[%c0_28, %c0_29] : memref<1x32xf32, #tpu.memory_space<vmem>>, vector<1x32xf32>
    %c0_30 = arith.constant 0 : index
    %c0_31 = arith.constant 0 : index
    %64 = vector.load %arg4[%c0_30, %c0_31] : memref<16x4xi32, #tpu.memory_space<vmem>>, vector<16x4xi32>
    %65 = tpu.iota {dimensions = array<i32: 1>} : vector<16x16xi32>
    %cst_32 = arith.constant 0.000000e+00 : f32
    %66 = vector.broadcast %cst_32 : f32 to vector<16x16xf32>
    %67 = vector.extract_strided_slice %64 {offsets = [0, 0], sizes = [16, 1], strides = [1, 1]} : vector<16x4xi32> to vector<16x1xi32>
    %68 = vector.broadcast %67 : vector<16x1xi32> to vector<16x16xi32>
    %69 = arith.cmpi eq, %68, %65 : vector<16x16xi32>
    %70 = arith.extui %69 : vector<16x16xi1> to vector<16x16xi32>
    %71 = arith.sitofp %70 : vector<16x16xi32> to vector<16x16xf32>
    %72 = arith.addf %66, %71 : vector<16x16xf32>
    %73 = vector.extract_strided_slice %64 {offsets = [0, 1], sizes = [16, 1], strides = [1, 1]} : vector<16x4xi32> to vector<16x1xi32>
    %74 = vector.broadcast %73 : vector<16x1xi32> to vector<16x16xi32>
    %75 = arith.cmpi eq, %74, %65 : vector<16x16xi32>
    %76 = arith.extui %75 : vector<16x16xi1> to vector<16x16xi32>
    %77 = arith.sitofp %76 : vector<16x16xi32> to vector<16x16xf32>
    %78 = arith.addf %72, %77 : vector<16x16xf32>
    %79 = vector.extract_strided_slice %64 {offsets = [0, 2], sizes = [16, 1], strides = [1, 1]} : vector<16x4xi32> to vector<16x1xi32>
    %80 = vector.broadcast %79 : vector<16x1xi32> to vector<16x16xi32>
    %81 = arith.cmpi eq, %80, %65 : vector<16x16xi32>
    %82 = arith.extui %81 : vector<16x16xi1> to vector<16x16xi32>
    %83 = arith.sitofp %82 : vector<16x16xi32> to vector<16x16xf32>
    %84 = arith.addf %78, %83 : vector<16x16xf32>
    %85 = vector.extract_strided_slice %64 {offsets = [0, 3], sizes = [16, 1], strides = [1, 1]} : vector<16x4xi32> to vector<16x1xi32>
    %86 = vector.broadcast %85 : vector<16x1xi32> to vector<16x16xi32>
    %87 = arith.cmpi eq, %86, %65 : vector<16x16xi32>
    %88 = arith.extui %87 : vector<16x16xi1> to vector<16x16xi32>
    %89 = arith.sitofp %88 : vector<16x16xi32> to vector<16x16xf32>
    %90 = arith.addf %84, %89 : vector<16x16xf32>
    %c-1_i32_33 = arith.constant -1 : i32
    %91 = vector.broadcast %c-1_i32_33 : i32 to vector<16x4xi32>
    %92 = arith.cmpi sgt, %64, %91 : vector<16x4xi32>
    %93 = arith.extui %92 : vector<16x4xi1> to vector<16x4xi32>
    %94 = arith.sitofp %93 : vector<16x4xi32> to vector<16x4xf32>
    %cst_34 = arith.constant dense<0.000000e+00> : vector<16xf32>
    %95 = vector.multi_reduction <add>, %94, %cst_34 [1] : vector<16x4xf32> to vector<16xf32>
    %96 = vector.shape_cast %95 : vector<16xf32> to vector<16x1xf32>
    %cst_35 = arith.constant 0.000000e+00 : f32
    %97 = vector.broadcast %cst_35 : f32 to vector<16x1xf32>
    %98 = arith.cmpf oeq, %96, %97 : vector<16x1xf32>
    %cst_36 = arith.constant 1.000000e+00 : f32
    %99 = vector.broadcast %cst_36 : f32 to vector<16x1xf32>
    %100 = arith.select %98, %99, %96 : vector<16x1xi1>, vector<16x1xf32>
    %cst_37 = arith.constant 1.000000e+00 : f32
    %101 = vector.broadcast %cst_37 : f32 to vector<16x1xf32>
    %102 = arith.divf %101, %100 : vector<16x1xf32>
    %c0_38 = arith.constant 0 : index
    %c0_39 = arith.constant 0 : index
    %103 = vector.load %arg3[%c0_38, %c0_39] : memref<16x24xf32, #tpu.memory_space<vmem>>, vector<16x24xf32>
    %c0_40 = arith.constant 0 : index
    %c0_41 = arith.constant 0 : index
    %104 = vector.load %arg5[%c0_40, %c0_41] : memref<24x16xf32, #tpu.memory_space<vmem>>, vector<24x16xf32>
    %c0_42 = arith.constant 0 : index
    %c0_43 = arith.constant 0 : index
    %105 = vector.load %arg6[%c0_42, %c0_43] : memref<24x16xf32, #tpu.memory_space<vmem>>, vector<24x16xf32>
    %cst_44 = arith.constant dense<0.000000e+00> : vector<16x16xf32>
    %106 = tpu.matmul %103, %104, %cst_44 {dimension_numbers = #tpu.dot_dimension_numbers<[1], [0], [0], [1], [0, 0, 1, 1], [], []>} : vector<16x24xf32>, vector<24x16xf32>, vector<16x16xf32> -> vector<16x16xf32>
    %cst_45 = arith.constant dense<0.000000e+00> : vector<16x16xf32>
    %107 = tpu.matmul %103, %105, %cst_45 {dimension_numbers = #tpu.dot_dimension_numbers<[1], [0], [0], [1], [0, 0, 1, 1], [], []>} : vector<16x24xf32>, vector<24x16xf32>, vector<16x16xf32> -> vector<16x16xf32>
    %cst_46 = arith.constant dense<0.000000e+00> : vector<16x16xf32>
    %108 = tpu.matmul %90, %107, %cst_46 {dimension_numbers = #tpu.dot_dimension_numbers<[1], [0], [0], [1], [0, 0, 1, 1], [], []>} : vector<16x16xf32>, vector<16x16xf32>, vector<16x16xf32> -> vector<16x16xf32>
    %109 = vector.broadcast %102 : vector<16x1xf32> to vector<16x16xf32>
    %110 = arith.mulf %108, %109 : vector<16x16xf32>
    %111 = arith.addf %106, %110 : vector<16x16xf32>
    %cst_47 = arith.constant 0.000000e+00 : f32
    %112 = vector.broadcast %cst_47 : f32 to vector<16x16xf32>
    %113 = arith.maximumf %111, %112 : vector<16x16xf32>
    %c0_48 = arith.constant 0 : index
    %c0_49 = arith.constant 0 : index
    %114 = vector.load %arg7[%c0_48, %c0_49] : memref<16x16xf32, #tpu.memory_space<vmem>>, vector<16x16xf32>
    %c0_50 = arith.constant 0 : index
    %c0_51 = arith.constant 0 : index
    %115 = vector.load %arg8[%c0_50, %c0_51] : memref<16x16xf32, #tpu.memory_space<vmem>>, vector<16x16xf32>
    %cst_52 = arith.constant dense<0.000000e+00> : vector<16x16xf32>
    %116 = tpu.matmul %113, %114, %cst_52 {dimension_numbers = #tpu.dot_dimension_numbers<[1], [0], [0], [1], [0, 0, 1, 1], [], []>} : vector<16x16xf32>, vector<16x16xf32>, vector<16x16xf32> -> vector<16x16xf32>
    %cst_53 = arith.constant dense<0.000000e+00> : vector<16x16xf32>
    %117 = tpu.matmul %113, %115, %cst_53 {dimension_numbers = #tpu.dot_dimension_numbers<[1], [0], [0], [1], [0, 0, 1, 1], [], []>} : vector<16x16xf32>, vector<16x16xf32>, vector<16x16xf32> -> vector<16x16xf32>
    %cst_54 = arith.constant dense<0.000000e+00> : vector<16x16xf32>
    %118 = tpu.matmul %90, %117, %cst_54 {dimension_numbers = #tpu.dot_dimension_numbers<[1], [0], [0], [1], [0, 0, 1, 1], [], []>} : vector<16x16xf32>, vector<16x16xf32>, vector<16x16xf32> -> vector<16x16xf32>
    %119 = vector.broadcast %102 : vector<16x1xf32> to vector<16x16xf32>
    %120 = arith.mulf %118, %119 : vector<16x16xf32>
    %121 = arith.addf %116, %120 : vector<16x16xf32>
    %cst_55 = arith.constant 0.000000e+00 : f32
    %122 = vector.broadcast %cst_55 : f32 to vector<16x16xf32>
    %123 = arith.maximumf %121, %122 : vector<16x16xf32>
    %c0_56 = arith.constant 0 : index
    %c0_57 = arith.constant 0 : index
    %124 = vector.load %arg10[%c0_56, %c0_57] : memref<16x32xf32, #tpu.memory_space<vmem>>, vector<16x32xf32>
    %cst_58 = arith.constant dense<0.000000e+00> : vector<16x32xf32>
    %125 = tpu.matmul %123, %124, %cst_58 {dimension_numbers = #tpu.dot_dimension_numbers<[1], [0], [0], [1], [0, 0, 1, 1], [], []>} : vector<16x16xf32>, vector<16x32xf32>, vector<16x32xf32> -> vector<16x32xf32>
    %126 = vector.broadcast %63 : vector<1x32xf32> to vector<16x32xf32>
    %127 = arith.addf %125, %126 : vector<16x32xf32>
    %c0_59 = arith.constant 0 : index
    %c0_60 = arith.constant 0 : index
    %128 = vector.load %arg13[%c0_59, %c0_60] : memref<16x32xf32, #tpu.memory_space<vmem>>, vector<16x32xf32>
    tpu.vector_store %arg13[%c0_59, %c0_60], %127 {strides = array<i32>} : memref<16x32xf32, #tpu.memory_space<vmem>>, vector<16x32xf32>,
    return
  }
  func.func @transform_0(%arg0: i32) -> (i32, i32) {
    %c0_i32 = arith.constant 0 : i32
    %c0_i32_0 = arith.constant 0 : i32
    %c0_i32_1 = arith.constant 0 : i32
    return %c0_i32, %c0_i32_0 : i32, i32
  }
  func.func @transform_1(%arg0: i32) -> (i32, i32) {
    %c0_i32 = arith.constant 0 : i32
    %c0_i32_0 = arith.constant 0 : i32
    %c0_i32_1 = arith.constant 0 : i32
    return %c0_i32, %c0_i32_0 : i32, i32
  }
  func.func @transform_2(%arg0: i32) -> (i32, i32) {
    %c0_i32 = arith.constant 0 : i32
    %c0_i32_0 = arith.constant 0 : i32
    %c0_i32_1 = arith.constant 0 : i32
    return %c0_i32, %c0_i32_0 : i32, i32
  }
  func.func @transform_3(%arg0: i32) -> (i32, i32) {
    %c0_i32 = arith.constant 0 : i32
    %c0_i32_0 = arith.constant 0 : i32
    %c0_i32_1 = arith.constant 0 : i32
    return %c0_i32, %c0_i32_0 : i32, i32
  }
  func.func @transform_4(%arg0: i32) -> (i32, i32) {
    %c0_i32 = arith.constant 0 : i32
    %c0_i32_0 = arith.constant 0 : i32
    %c0_i32_1 = arith.constant 0 : i32
    return %c0_i32, %c0_i32_0 : i32, i32
  }
  func.func @transform_5(%arg0: i32) -> (i32, i32) {
    %c0_i32 = arith.constant 0 : i32
    %c0_i32_0 = arith.constant 0 : i32
    %c0_i32_1 = arith.constant 0 : i32
    return %c0_i32, %c0_i32_0 : i32, i32
  }
  func.func @transform_6(%arg0: i32) -> (i32, i32) {
    %c0_i32 = arith.constant 0 : i32
    %c0_i32_0 = arith.constant 0 : i32
    %c0_i32_1 = arith.constant 0 : i32
    return %c0_i32, %c0_i32_0 : i32, i32
  }
  func.func @transform_7(%arg0: i32) -> (i32, i32) {
    %c0_i32 = arith.constant 0 : i32
    %c0_i32_0 = arith.constant 0 : i32
    %c0_i32_1 = arith.constant 0 : i32
    return %c0_i32, %c0_i32_0 : i32, i32
  }
  func.func @transform_8(%arg0: i32) -> (i32, i32) {
    %c0_i32 = arith.constant 0 : i32
    %c0_i32_0 = arith.constant 0 : i32
    %c0_i32_1 = arith.constant 0 : i32
    return %c0_i32, %c0_i32_0 : i32, i32
  }
  func.func @transform_9(%arg0: i32) -> (i32, i32) {
    %c0_i32 = arith.constant 0 : i32
    %c0_i32_0 = arith.constant 0 : i32
    %c0_i32_1 = arith.constant 0 : i32
    return %c0_i32, %c0_i32_0 : i32, i32
  }
  func.func @transform_10(%arg0: i32) -> (i32, i32) {
    %c0_i32 = arith.constant 0 : i32
    %c0_i32_0 = arith.constant 0 : i32
    %c0_i32_1 = arith.constant 0 : i32
    return %c0_i32, %c0_i32_0 : i32, i32
  }
  func.func @transform_11(%arg0: i32) -> (i32, i32) {
    %c0_i32 = arith.constant 0 : i32
    %c0_i32_0 = arith.constant 0 : i32
    %c0_i32_1 = arith.constant 0 : i32
    return %c0_i32, %c0_i32_0 : i32, i32
  }
  func.func @transform_12(%arg0: i32) -> (i32, i32) {
    %c0_i32 = arith.constant 0 : i32
    %c0_i32_0 = arith.constant 0 : i32
    %c0_i32_1 = arith.constant 0 : i32
    return %c0_i32, %c0_i32_0 : i32, i32
  }
}

</mosaic_0001>

<bundles_post_ra>
// kernel: tpu_custom_call.1
= control target key start
LH: loop header
LB: loop body
LE: loop exit
PB: predicated region body
PF: predicated region fallthrough
CT: control target
= control target key end

     0   :  { %18 = vsyncpa [#allocation3], 0  ;;  %vm211_vm0 = vcmask 195584   ;;  %v2011_v4 = vmov 0   ;;  %s2430_s0 = inlined_call_operand.vmem [shape: f32[32,24], index: 0, kind: input, shape index: {}]   ;;  %s2431_s1 = inlined_call_operand.vmem [shape: s32[32,4], index: 1, kind: input, shape index: {}]   ;;  %s2432_s2 = inlined_call_operand.vmem [shape: f32[16,24], index: 2, kind: input, shape index: {}]   ;;  %s2433_s3 = inlined_call_operand.vmem [shape: s32[16,4], index: 3, kind: input, shape index: {}]   ;;  %s2434_s4 = inlined_call_operand.vmem [shape: f32[24,16], index: 4, kind: input, shape index: {}]   ;;  %s2435_s5 = inlined_call_operand.vmem [shape: f32[24,16], index: 5, kind: input, shape index: {}]   ;;  %s2436_s6 = inlined_call_operand.vmem [shape: f32[16,16], index: 6, kind: input, shape index: {}]   ;;  %s2437_s7 = inlined_call_operand.vmem [shape: f32[16,16], index: 7, kind: input, shape index: {}]   ;;  %s2438_s8 = inlined_call_operand.vmem [shape: f32[16,32], index: 8, kind: input, shape index: {}]   ;;  %s2439_s9 = inlined_call_operand.vmem [shape: f32[16,32], index: 9, kind: input, shape index: {}]   ;;  %s2440_s10 = inlined_call_operand.vmem [shape: f32[1,32], index: 10, kind: input, shape index: {}]   ;;  %s2441_s11 = inlined_call_operand.hbm [shape: f32[32,32], index: 11, kind: output, shape index: {0}]   ;;  %s2442_s12 = inlined_call_operand.hbm [shape: f32[16,32], index: 12, kind: output, shape index: {1}]  }
   0x1   :  { %v208_v0 = vld [vmem:[%s2435_s5] sm:$0xff]  ;;  %v209_v1 = vld [vmem:[%s2435_s5 + $0x8] sm:$0xff]  ;;  %1934 = vset.pattern.permute.xlu1 %v2011_v4  ;;  %1932 = vset.pattern.permute.xlu0 %v2011_v4  ;;  %v2099_v5 = vld [vmem:[%s2435_s5 + $0x10] sm:$0xff] }
   0x2   :  { %v2091_v2 = vpack.c.bf16 %v209_v1, %v208_v0  ;;  %v201_v3 = vld [vmem:[%s2430_s0] sm:$0xff]  ;;  %v2105_v6 = vld [vmem:[%s2431_s1 + $0x8] sm:$0xff] }
   0x3   :  { %1730 = vmatprep.mubr.msk.f32.mxu0 %vm211_vm0, %v201_v3  ;;  %v2110_v7 = vld [vmem:[%s2431_s1] sm:$0xff]  ;;  %52 = vperm.xlu1 %1934, %v2105_v6  }
   0x4   :  { %1860 = vmatprep.subr.bf16.mxu0 %v2091_v2 }
   0x5   :  { %19 = vsyncpa [#allocation5], 0  ;;  %1862 = vmatpush3.bf16.msra.mxu0 %v2091_v2  ;;  %49 = vperm.xlu0 %1932, %v2110_v7   ;;  %v202_v8 = vld [vmem:[%s2430_s0 + $0x8] sm:$0xff]  ;;  %v203_v9 = vld [vmem:[%s2430_s0 + $0x10] sm:$0xff]  ;;  %v2012_v10 = vmov 1   ;;  %v2013_v12 = vmov 2   ;;  %v46_v29 = vlaneseq }
   0x6   :  { %1728 = vmatprep.subr.mxu0 %v2099_v5  ;;  %v204_v11 = vld [vmem:[%s2430_s0 + $0x18] sm:$0xff]  ;;  %v2014_v13 = vmov 3   ;;  %v44_v14 = vld [vmem:[%s2431_s1 + $0x10] sm:$0xff]  ;;  %v205_v16 = vld [vmem:[%s2434_s4] sm:$0xff]  ;;  %vm160_vm1 = vcmp.gt.s32.totalorder %v2110_v7, 4294967295  ;;  %vm172_vm2 = vcmask 31744  }
   0x7   :  { %1935 = vset.pattern.permute.xlu1 %v2012_v10  ;;  %v45_v15 = vld [vmem:[%s2431_s1 + $0x18] sm:$0xff]  ;;  %v206_v17 = vld [vmem:[%s2434_s4 + $0x8] sm:$0xff]  ;;  %v2160_v19 = vld [vmem:[%s2434_s4 + $0x10] sm:$0xff]  ;;  %vm161_vm3 = vcmp.gt.s32.totalorder %v2105_v6, 4294967295  ;;  %vm162_vm4 = vcmp.gt.s32.totalorder %v44_v14, 4294967295  ;;  %v2015_v20 = vmov 0.0  }
   0x8   :  { %80 = vperm.xlu1 %1935, %v2105_v6   ;;  %v2155_v18 = vpack.c.bf16 %v206_v17, %v205_v16  ;;  %v1589_v21 = vsel %vm160_vm1, 1.0, %v2015_v20  ;;  %v1590_v22 = vsel %vm161_vm3, 1.0, %v2015_v20  ;;  %v1591_v23 = vsel %vm162_vm4, 1.0, %v2015_v20  ;;  %s2016_s26 = smov [#allocation2]  }
   0x9   :  { %1729 = vmatpush3.msra.mxu0 %v2099_v5  ;;  %1933 = vset.pattern.permute.xlu0 %v2012_v10  ;;  %v173_v24 = vsel %vm172_vm2, %v1589_v21, 0.0  ;;  %v176_v25 = vsel %vm172_vm2, %v1590_v22, 0.0  ;;  %vm163_vm5 = vcmp.gt.s32.totalorder %v45_v15, 4294967295  ;;  %v179_v26 = vsel %vm172_vm2, %v1591_v23, 0.0  ;;  %s1546_s27 = sshll.u32 %s2016_s26, 4  ;;  %s1547_s27 = int_to_ptr.vmem [resolvable:$true] %s1546_s27 }
   0xa   :  { %1731 = vmatmul.mubr.msk.f32.vlgmr.msra.gmra.mrb[0].mxu0 %vm211_vm0, %v202_v8  ;;  %77 = vperm.xlu0 %1933, %v2110_v7   ;;  %v1592_v27 = vsel %vm163_vm5, 1.0, %v2015_v20  ;;  %v2183_v30 = vand.u32 127, %v46_v29  ;;  %vm309_vm12 = vcmask 261120   ;;  %s1963_s28 = scalar_lea.vmem %s1547_s27, 512  ;;  %p1968_p1 = scmp.lt.s32.totalorder %s1547_s27, %s1547_s27 }
   0xb   :  { %1733 = vmatprep.mubr.msk.f32.mxu0 %vm211_vm0, %v203_v9  ;;  %1872 = vmatprep.subr.bf16.mxu0 %v2155_v18  ;;  %v182_v28 = vsel %vm172_vm2, %v1592_v27, 0.0  ;;  %v503_v27 = vld [vmem:[%s2437_s7 + $0x8] sm:$0xff]  ;;  %p1964_p0 = scmp.ne.s32.totalorder %s1547_s27, %s1963_s28  ;;  %p1969_p2 = scmp.lt.s32.totalorder %s1963_s28, %s1963_s28 }
   0xc   :  { %1936 = vset.pattern.permute.xlu1 %v2013_v12  ;;  %1874 = vmatpush3.bf16.msra.mxu0 %v2155_v18 }
   0xd   :  { %105 = vperm.xlu1 %1936, %v2110_v7   ;;  %1754 = vmatprep.subr.mxu0 %v2160_v19  ;;  %p1970_p3 = por %p1969_p2, %p1968_p1 }
   0xe   :  { %1734 = vmatmul.mubr.msk.f32.gmra.mrb[2].mxu0 %vm211_vm0, %v204_v11  ;;  %1939 = vset.pattern.permute.xlu0 %v2014_v13 }
   0xf   :  { %1756 = vmatprep.mubr.msk.f32.mxu0 %vm211_vm0, %v201_v3  ;;  %133 = vperm.xlu0 %1939, %v2110_v7   ;;  %p1971_p4 = pnand %p1970_p3, %p1964_p0 }
  0x10   :  { %1755 = vmatpush3.msra.mxu0 %v2160_v19 }
  0x11   :  { %1937 = vset.pattern.permute.xlu1 %v2011_v4 }
  0x12   :  { %55 = vperm.xlu1 %1937, %v44_v14   ;;  %1757 = vmatmul.mubr.msk.f32.vlgmr.msra.gmra.mrb[4].mxu0 %vm211_vm0, %v202_v8 }
  0x13   :  { %136 = vperm.xlu0 %1939, %v2105_v6   ;;  %1759 = vmatprep.mubr.msk.f32.mxu0 %vm211_vm0, %v203_v9 }
  0x16   :  { %1938 = vset.pattern.permute.xlu1 %v2012_v10  ;;  %1760 = vmatmul.mubr.msk.f32.gmra.mrb[6].mxu0 %vm211_vm0, %v204_v11 }
  0x17   :  { %83 = vperm.xlu1 %1938, %v44_v14   ;;  %1942 = vset.pattern.permute.xlu0 %v2013_v12 }
  0x18   :  { %108 = vperm.xlu0 %1942, %v2105_v6  }
  0x1b   :  { %1940 = vset.pattern.permute.xlu1 %v2011_v4 }
  0x1c   :  { %58 = vperm.xlu1 %1940, %v45_v15   ;;  %114 = vperm.xlu0 %1942, %v45_v15  }
  0x20   :  { %1941 = vset.pattern.permute.xlu1 %v2012_v10  ;;  %1946 = vset.pattern.permute.xlu0 %v2012_v10 }
  0x21   :  { %86 = vperm.xlu1 %1941, %v45_v15  }
  0x25   :  { %1943 = vset.pattern.permute.xlu1 %v2013_v12 }
  0x26   :  { %111 = vperm.xlu1 %1943, %v44_v14  }
  0x2a   :  { %1944 = vset.pattern.permute.xlu1 %v2014_v13 }
  0x2b   :  { %139 = vperm.xlu1 %1944, %v44_v14  }
  0x2f   :  { %142 = vperm.xlu1 %1944, %v45_v15  }
  0x33   :  { %1945 = vset.pattern.permute.xlu1 %v2011_v4 }
  0x3b   :  { %174 = vadd.xlane.f32.xlu0 %v173_v24 }
  0x3f   :  { %180 = vadd.xlane.f32.xlu0 %v179_v26  ;;  %v502_v26 = vld [vmem:[%s2437_s7] sm:$0xff] }
  0x40   :  { %v2237_v29 = vpack.c.bf16 %v503_v27, %v502_v26 }
  0x43   :  { %183 = vadd.xlane.f32.xlu0 %v182_v28 }
  0x53   :  { %177 = vadd.xlane.f32.xlu1 %v176_v25 }
  0x82   :  { %v53_v31 = vpop.permute.xlu1 %52 }
  0x83   :  { %vm61_vm6 = vcmp.eq.s32.totalorder %v53_v31, %v2183_v30 }
  0x84   :  { %v50_v32 = vpop.permute.xlu0 %49  ;;  %v1574_v33 = vsel %vm61_vm6, 1.0, %v2015_v20 }
  0x85   :  { %vm60_vm7 = vcmp.eq.s32.totalorder %v50_v32, %v2183_v30 }
  0x86   :  { %v1573_v35 = vsel %vm60_vm7, 1.0, %v2015_v20 }
  0x87   :  { %v81_v34 = vpop.permute.xlu1 %80 }
  0x88   :  { %vm89_vm8 = vcmp.eq.s32.totalorder %v81_v34, %v2183_v30  ;;  %v501_v34 = vld [vmem:[%s2436_s6 + $0x8] sm:$0xff] }
  0x89   :  { %v78_v36 = vpop.permute.xlu0 %77  ;;  %v1578_v37 = vsel %vm89_vm8, 1.0, %v2015_v20 }
  0x8a   :  { %vm88_vm9 = vcmp.eq.s32.totalorder %v78_v36, %v2183_v30  ;;  %v101_v38 = vadd.f32 %v1578_v37, %v1574_v33  ;;  %v500_v33 = vld [vmem:[%s2436_s6] sm:$0xff] }
  0x8b   :  { %v1577_v39 = vsel %vm88_vm9, 1.0, %v2015_v20 }
  0x8c   :  { %v100_v40 = vadd.f32 %v1577_v39, %v1573_v35  ;;  %v106_v41 = vpop.permute.xlu1 %105  ;;  %v2247_v35 = vpack.c.bf16 %v501_v34, %v500_v33 }
  0x8d   :  { %vm116_vm10 = vcmp.eq.s32.totalorder %v106_v41, %v2183_v30 }
  0x8e   :  { %v134_v42 = vpop.permute.xlu0 %133  ;;  %v1581_v43 = vsel %vm116_vm10, 1.0, %v2015_v20 }
  0x8f   :  { %vm144_vm11 = vcmp.eq.s32.totalorder %v134_v42, %v2183_v30  ;;  %v128_v44 = vadd.f32 %v1581_v43, %v100_v40 }
  0x90   :  { %v1585_v45 = vsel %vm144_vm11, 1.0, %v2015_v20 }
  0x91   :  { %v156_v46 = vadd.f32 %v1585_v45, %v128_v44  ;;  %v56_v47 = vpop.permute.xlu1 %55 }
  0x92   :  { %v137_v51 = vpop.permute.xlu0 %136  ;;  %vm62_vm13 = vcmp.eq.s32.totalorder %v56_v47, %v2183_v30 }
  0x93   :  { %1744 = vmatprep.mubr.msk.f32.mxu1 %vm309_vm12, %v156_v46  ;;  %1780 = vmatprep.mubr.msk.f32.mxu0 %vm309_vm12, %v156_v46  ;;  %v1575_v54 = vsel %vm62_vm13, 1.0, %v2015_v20  ;;  %vm145_vm5 = vcmp.eq.s32.totalorder %v137_v51, %v2183_v30 }
  0x94   :  { %v1586_v11 = vsel %vm145_vm5, 1.0, %v2015_v20 }
  0x96   :  { %v84_v48 = vpop.permute.xlu1 %83 }
  0x97   :  { %v109_v53 = vpop.permute.xlu0 %108  ;;  %vm90_vm14 = vcmp.eq.s32.totalorder %v84_v48, %v2183_v30 }
  0x98   :  { %vm117_vm15 = vcmp.eq.s32.totalorder %v109_v53, %v2183_v30  ;;  %v1579_v55 = vsel %vm90_vm14, 1.0, %v2015_v20  ;;  %vm504_vm14 = vcmask 130048  }
  0x99   :  { %v1582_v61 = vsel %vm117_vm15, 1.0, %v2015_v20  ;;  %v102_v62 = vadd.f32 %v1579_v55, %v1575_v54 }
  0x9a   :  { %v129_v7 = vadd.f32 %v1582_v61, %v101_v38 }
  0x9b   :  { %v59_v49 = vpop.permute.xlu1 %58  ;;  %v115_v56 = vpop.permute.xlu0 %114 }
  0x9c   :  { %vm63_vm1 = vcmp.eq.s32.totalorder %v59_v49, %v2183_v30  ;;  %vm119_vm6 = vcmp.eq.s32.totalorder %v115_v56, %v2183_v30  ;;  %v2218_v17 = vadd.f32 %v1586_v11, %v129_v7 }
  0x9d   :  { %v1576_v63 = vsel %vm63_vm1, 1.0, %v2015_v20  ;;  %v1584_v15 = vsel %vm119_vm6, 1.0, %v2015_v20 }
  0xa0   :  { %v87_v50 = vpop.permute.xlu1 %86 }
  0xa1   :  { %vm91_vm3 = vcmp.eq.s32.totalorder %v87_v50, %v2183_v30 }
  0xa2   :  { %v1580_v0 = vsel %vm91_vm3, 1.0, %v2015_v20 }
  0xa3   :  { %v103_v8 = vadd.f32 %v1580_v0, %v1576_v63  ;;  %v2276_v0 = vld [vmem:[%s2432_s2] sm:$0xff] }
  0xa5   :  { %v112_v52 = vpop.permute.xlu1 %111  ;;  %v131_v21 = vadd.f32 %v1584_v15, %v103_v8 }
  0xa6   :  { %vm118_vm4 = vcmp.eq.s32.totalorder %v112_v52, %v2183_v30 }
  0xa7   :  { %v1583_v1 = vsel %vm118_vm4, 1.0, %v2015_v20 }
  0xa8   :  { %v130_v14 = vadd.f32 %v1583_v1, %v102_v62  ;;  %v2285_v1 = vld [vmem:[%s2432_s2 + $0x8] sm:$0xff] }
  0xaa   :  { %v140_v58 = vpop.permute.xlu1 %139 }
  0xab   :  { %vm146_vm7 = vcmp.eq.s32.totalorder %v140_v58, %v2183_v30 }
  0xac   :  { %v1587_v16 = vsel %vm146_vm7, 1.0, %v2015_v20 }
  0xad   :  { %v2220_v22 = vadd.f32 %v1587_v16, %v130_v14 }
  0xae   :  { %v143_v4 = vpop.permute.xlu1 %142 }
  0xaf   :  { %vm147_vm8 = vcmp.eq.s32.totalorder %v143_v4, %v2183_v30 }
  0xb0   :  { %v1588_v23 = vsel %vm147_vm8, 1.0, %v2015_v20 }
  0xb1   :  { %v2227_v24 = vadd.f32 %v1588_v23, %v131_v21 }
  0xc8   :  { %v175_v36 = vpop.xlane.xlu0 %174 }
  0xc9   :  { %vm185_vm10 = vcmp.eq.f32.partialorder %v175_v36, 0.0 }
  0xca   :  { %v189_v41 = vsel %vm185_vm10, 1.0, %v175_v36 }
  0xcc   :  { %v181_v37 = vpop.xlane.xlu0 %180 }
  0xcd   :  { %vm187_vm13 = vcmp.eq.f32.partialorder %v181_v37, 0.0 }
  0xce   :  { %v191_v43 = vsel %vm187_vm13, 1.0, %v181_v37 }
  0xd0   :  { %v184_v39 = vpop.xlane.xlu0 %183 }
  0xd1   :  { %vm188_vm11 = vcmp.eq.f32.partialorder %v184_v39, 0.0 }
  0xd2   :  { %v192_v42 = vsel %vm188_vm11, 1.0, %v184_v39 }
  0xdd   :  { %v1732_v57 = vpop.f32.mrb[0].mxu0 }
  0xde   :  { %v290_v59 = vpop.f32.mrb[1].mxu0 }
  0xdf   :  { %v1863_v60 = vpack.c.bf16 %v1732_v57, %v290_v59 }
  0xe0   :  { %v178_v38 = vpop.xlane.xlu1 %177 }
  0xe1   :  { %v1735_v3 = vpop.f32.mrb[2].mxu0  ;;  %1864 = vmatprep.subr.bf16.mxu1 %v1863_v60  ;;  %vm186_vm9 = vcmp.eq.f32.partialorder %v178_v38, 0.0 }
  0xe2   :  { %v300_v6 = vpop.f32.mrb[3].mxu0  ;;  %1866 = vmatpush3.bf16.msra.mxu1 %v1863_v60  ;;  %v190_v40 = vsel %vm186_vm9, 1.0, %v178_v38 }
  0xe3   :  { %v1867_v9 = vpack.c.bf16 %v1735_v3, %v300_v6  ;;  %1951 = vrcp.f32 %v190_v40 }
  0xe4   :  { %1953 = vrcp.f32 %v189_v41 }
  0xe5   :  { %1868 = vmatprep.subr.bf16.mxu1 %v1867_v9  ;;  %v1758_v25 = vpop.f32.mrb[4].mxu0  ;;  %1955 = vrcp.f32 %v192_v42 }
  0xe6   :  { %1870 = vmatpush3.bf16.msra.mxu1 %v1867_v9  ;;  %v477_v28 = vpop.f32.mrb[5].mxu0  ;;  %1957 = vrcp.f32 %v191_v43 }
  0xe7   :  { %1876 = vmatprep.subr.bf16.mxu1 %v2237_v29 }
  0xe9   :  { %1745 = vmatmul.mubr.msk.f32.vlgmr.msra.gmra.mrb[0].mxu1 %vm309_vm12, %v2218_v17  ;;  %v1761_v31 = vpop.f32.mrb[6].mxu0 }
  0xea   :  { %1747 = vmatprep.mubr.msk.f32.mxu1 %vm309_vm12, %v2220_v22  ;;  %1878 = vmatpush3.bf16.msra.mxu1 %v2237_v29  ;;  %v487_v32 = vpop.f32.mrb[7].mxu0 }
  0xeb   :  { %1888 = vmatprep.subr.bf16.mxu1 %v2247_v35 }
  0xed   :  { %1748 = vmatmul.mubr.msk.f32.gmra.mrb[2].mxu1 %vm309_vm12, %v2227_v24  ;;  %v2250_v44 = vpop.eup %1951 }
  0xee   :  { %v2252_v46 = vpop.eup %1953 }
  0xef   :  { %v2255_v49 = vpop.eup %1955 }
  0xf0   :  { %v2258_v54 = vpop.eup %1957 }
 0x1bc   :  { %v1746_v45 = vpop.f32.mrb[0].mxu1 }
 0x1bd   :  { %v408_v47 = vmul.f32 %v2250_v44, %v1746_v45  ;;  %v388_v48 = vpop.f32.mrb[1].mxu1 }
 0x1be   :  { %v407_v50 = vmul.f32 %v2252_v46, %v388_v48 }
 0x1bf   :  { %v483_v51 = vadd.f32 %v1758_v25, %v408_v47  ;;  %v780_v47 = vld [vmem:[%s2438_s8] sm:$0xff] }
 0x1c0   :  { %v478_v52 = vadd.f32 %v477_v28, %v407_v50  ;;  %v1749_v53 = vpop.f32.mrb[2].mxu1 }
 0x1c1   :  { %v410_v55 = vmul.f32 %v2255_v49, %v1749_v53  ;;  %v398_v56 = vpop.f32.mrb[3].mxu1  ;;  %v497_v59 = vmax.f32 %v483_v51, 0.0 }
 0x1c2   :  { %v496_v57 = vmax.f32 %v478_v52, 0.0  ;;  %v409_v58 = vmul.f32 %v2258_v54, %v398_v56 }
 0x1c3   :  { %v493_v60 = vadd.f32 %v1761_v31, %v410_v55 }
 0x1c4   :  { %v488_v61 = vadd.f32 %v487_v32, %v409_v58  ;;  %1766 = vmatprep.mubr.msk.f32.mxu1 %vm504_vm14, %v496_v57 }
 0x1c5   :  { %1767 = vmatmul.mubr.msk.f32.vlgmr.msra.gmra.mrb[4].mxu1 %vm504_vm14, %v497_v59  ;;  %v499_v63 = vmax.f32 %v493_v60, 0.0 }
 0x1c6   :  { %v498_v62 = vmax.f32 %v488_v61, 0.0  ;;  %1890 = vmatpush3.bf16.msra.mxu1 %v2247_v35 }
 0x1c7   :  { %1896 = vmatprep.subr.bf16.mxu1 %v2091_v2 }
 0x1c8   :  { %1769 = vmatprep.mubr.msk.f32.mxu1 %vm504_vm14, %v498_v62 }
 0x1c9   :  { %1770 = vmatmul.mubr.msk.f32.gmra.mrb[6].mxu1 %vm504_vm14, %v499_v63 }
 0x1ca   :  { %1790 = vmatprep.mubr.msk.f32.mxu1 %vm504_vm14, %v496_v57 }
 0x1cd   :  { %1791 = vmatmul.mubr.msk.f32.vlgmr.msra.gmra.mrb[8].mxu1 %vm504_vm14, %v497_v59 }
 0x1ce   :  { %1793 = vmatprep.mubr.msk.f32.mxu1 %vm504_vm14, %v498_v62  ;;  %1898 = vmatpush3.bf16.msra.mxu1 %v2091_v2  ;;  %v2292_v2 = vld [vmem:[%s2433_s3] sm:$0xff] }
 0x1cf   :  { %1810 = vmatprep.subr.mxu1 %v2099_v5  ;;  %887 = vperm.xlu1 %1945, %v2292_v2   ;;  %vm942_vm9 = vcmp.gt.s32.totalorder %v2292_v2, 4294967295 }
 0x1d0   :  { %901 = vperm.xlu0 %1946, %v2292_v2  }
 0x1d1   :  { %1794 = vmatmul.mubr.msk.f32.gmra.mrb[10].mxu1 %vm504_vm14, %v499_v63 }
 0x1d2   :  { %1811 = vmatpush3.msra.mxu1 %v2099_v5  ;;  %1812 = vmatprep.mubr.msk.f32.mxu1 %vm211_vm0, %v2276_v0  ;;  %v2299_v5 = vld [vmem:[%s2433_s3 + $0x8] sm:$0xff] }
 0x1d3   :  { %890 = vperm.xlu1 %1945, %v2299_v5   ;;  %vm943_vm10 = vcmp.gt.s32.totalorder %v2299_v5, 4294967295 }
 0x1d4   :  { %1950 = vset.pattern.permute.xlu0 %v2014_v13  ;;  %v1630_v50 = vsel %vm943_vm10, 1.0, %v2015_v20 }
 0x1d5   :  { %1813 = vmatmul.mubr.msk.f32.vlgmr.msra.gmra.mrb[12].mxu1 %vm211_vm0, %v2285_v1  ;;  %v951_v52 = vsel %vm172_vm2, %v1630_v50, 0.0 }
 0x1d7   :  { %1947 = vset.pattern.permute.xlu1 %v2012_v10 }
 0x1d8   :  { %904 = vperm.xlu1 %1947, %v2299_v5  }
 0x1dc   :  { %1948 = vset.pattern.permute.xlu1 %v2013_v12 }
 0x1dd   :  { %915 = vperm.xlu1 %1948, %v2292_v2  }
 0x1e1   :  { %918 = vperm.xlu1 %1948, %v2299_v5  }
 0x1e5   :  { %1949 = vset.pattern.permute.xlu1 %v2014_v13 }
 0x1e6   :  { %929 = vperm.xlu1 %1949, %v2292_v2  }
 0x1ea   :  { %932 = vperm.xlu1 %1949, %v2299_v5  }
 0x1ef   :  { %952 = vadd.xlane.f32.xlu0 %v951_v52 }
 0x24e   :  { %v888_v14 = vpop.permute.xlu1 %887 }
 0x24f   :  { %v902_v25 = vpop.permute.xlu0 %901  ;;  %vm892_vm15 = vcmp.eq.s32.totalorder %v888_v14, %v2183_v30 }
 0x250   :  { %vm906_vm1 = vcmp.eq.s32.totalorder %v902_v25, %v2183_v30  ;;  %v1621_v26 = vsel %vm892_vm15, 1.0, %v2015_v20 }
 0x252   :  { %v891_v23 = vpop.permute.xlu1 %890 }
 0x253   :  { %vm893_vm3 = vcmp.eq.s32.totalorder %v891_v23, %v2183_v30 }
 0x254   :  { %v1622_v31 = vsel %vm893_vm3, 1.0, %v2015_v20 }
 0x298   :  { %v1768_v3 = vpop.f32.mrb[4].mxu1 }
 0x299   :  { %v583_v4 = vpop.f32.mrb[5].mxu1 }
 0x29a   :  { %v1879_v6 = vpack.c.bf16 %v1768_v3, %v583_v4 }
 0x29c   :  { %v1771_v7 = vpop.f32.mrb[6].mxu1  ;;  %1880 = vmatprep.subr.bf16.mxu0 %v1879_v6 }
 0x29d   :  { %v593_v10 = vpop.f32.mrb[7].mxu1  ;;  %1882 = vmatpush3.bf16.msra.mxu0 %v1879_v6 }
 0x29e   :  { %v1883_v8 = vpack.c.bf16 %v1771_v7, %v593_v10 }
 0x2a0   :  { %1884 = vmatprep.subr.bf16.mxu0 %v1883_v8  ;;  %v2311_v12 = vpop.f32.mrb[8].mxu1 }
 0x2a1   :  { %1886 = vmatpush3.bf16.msra.mxu0 %v1883_v8  ;;  %v2313_v9 = vpop.f32.mrb[9].mxu1 }
 0x2a4   :  { %1781 = vmatmul.mubr.msk.f32.vlgmr.msra.gmra.mrb[8].mxu0 %vm309_vm12, %v2218_v17  ;;  %v2317_v13 = vpop.f32.mrb[10].mxu1  ;;  %v905_v17 = vpop.permute.xlu1 %904 }
 0x2a5   :  { %1783 = vmatprep.mubr.msk.f32.mxu0 %vm309_vm12, %v2220_v22  ;;  %v2321_v11 = vpop.f32.mrb[11].mxu1  ;;  %vm907_vm4 = vcmp.eq.s32.totalorder %v905_v17, %v2183_v30 }
 0x2a6   :  { %v1624_v32 = vsel %vm907_vm4, 1.0, %v2015_v20 }
 0x2a7   :  { %v913_v34 = vadd.f32 %v1624_v32, %v1622_v31 }
 0x2a8   :  { %1784 = vmatmul.mubr.msk.f32.gmra.mrb[10].mxu0 %vm309_vm12, %v2227_v24  ;;  %v1814_v15 = vpop.f32.mrb[12].mxu1  ;;  %v916_v22 = vpop.permute.xlu1 %915  ;;  %v1623_v24 = vsel %vm906_vm1, 1.0, %v2015_v20 }
 0x2a9   :  { %v1042_v16 = vpop.f32.mrb[13].mxu1  ;;  %vm920_vm5 = vcmp.eq.s32.totalorder %v916_v22, %v2183_v30  ;;  %v912_v28 = vadd.f32 %v1623_v24, %v1621_v26 }
 0x2aa   :  { %v1899_v21 = vpack.c.bf16 %v1814_v15, %v1042_v16  ;;  %v1625_v33 = vsel %vm920_vm5, 1.0, %v2015_v20 }
 0x2ab   :  { %v926_v36 = vadd.f32 %v1625_v33, %v912_v28 }
 0x2ac   :  { %1900 = vmatprep.subr.bf16.mxu1 %v1899_v21  ;;  %v919_v27 = vpop.permute.xlu1 %918 }
 0x2ad   :  { %1902 = vmatpush3.bf16.msra.mxu1 %v1899_v21  ;;  %vm921_vm6 = vcmp.eq.s32.totalorder %v919_v27, %v2183_v30  ;;  %v1450_v27 = vld [vmem:[%s2439_s9] sm:$0xff] }
 0x2ae   :  { %1908 = vmatprep.subr.bf16.mxu1 %v2237_v29  ;;  %v1626_v37 = vsel %vm921_vm6, 1.0, %v2015_v20 }
 0x2af   :  { %v927_v40 = vadd.f32 %v1626_v37, %v913_v34 }
 0x2b0   :  { %v930_v38 = vpop.permute.xlu1 %929 }
 0x2b1   :  { %vm934_vm7 = vcmp.eq.s32.totalorder %v930_v38, %v2183_v30 }
 0x2b2   :  { %v1627_v39 = vsel %vm934_vm7, 1.0, %v2015_v20 }
 0x2b3   :  { %v940_v41 = vadd.f32 %v1627_v39, %v926_v36 }
 0x2b4   :  { %v933_v42 = vpop.permute.xlu1 %932 }
 0x2b5   :  { %vm935_vm8 = vcmp.eq.s32.totalorder %v933_v42, %v2183_v30  ;;  %1819 = vmatprep.mubr.msk.f32.mxu1 %vm504_vm14, %v940_v41  ;;  %v781_v30 = vld [vmem:[%s2438_s8 + $0x8] sm:$0xff] }
 0x2b6   :  { %v1628_v43 = vsel %vm935_vm8, 1.0, %v2015_v20  ;;  %v1891_v48 = vpack.c.bf16 %v781_v30, %v780_v47 }
 0x2b7   :  { %v2343_v45 = vadd.f32 %v1628_v43, %v927_v40 }
 0x2b8   :  { %1892 = vmatprep.subr.bf16.mxu0 %v1891_v48 }
 0x2b9   :  { %1820 = vmatmul.mubr.msk.f32.vlgmr.msra.gmra.mrb[14].mxu1 %vm504_vm14, %v2343_v45  ;;  %1894 = vmatpush3.bf16.msra.mxu0 %v1891_v48 }
 0x2ba   :  { %1910 = vmatpush3.bf16.msra.mxu1 %v2237_v29  ;;  %1904 = vmatprep.subr.bf16.mxu0 %v2155_v18  ;;  %v1629_v29 = vsel %vm942_vm9, 1.0, %v2015_v20 }
 0x2bb   :  { %1916 = vmatprep.subr.bf16.mxu1 %v2247_v35  ;;  %v948_v51 = vsel %vm172_vm2, %v1629_v29, 0.0 }
 0x2bc   :  { %949 = vadd.xlane.f32.xlu1 %v948_v51 }
 0x349   :  { %v950_v4 = vpop.xlane.xlu1 %949 }
 0x34a   :  { %vm954_vm11 = vcmp.eq.f32.partialorder %v950_v4, 0.0 }
 0x34b   :  { %v956_v7 = vsel %vm954_vm11, 1.0, %v950_v4 }
 0x377   :  { %v1782_v53 = vpop.f32.mrb[8].mxu0 }
 0x378   :  { %v688_v55 = vmul.f32 %v2250_v44, %v1782_v53  ;;  %v668_v56 = vpop.f32.mrb[9].mxu0 }
 0x379   :  { %v687_v57 = vmul.f32 %v2252_v46, %v668_v56 }
 0x37a   :  { %v763_v58 = vadd.f32 %v2311_v12, %v688_v55 }
 0x37b   :  { %v758_v59 = vadd.f32 %v2313_v9, %v687_v57  ;;  %v1785_v60 = vpop.f32.mrb[10].mxu0 }
 0x37c   :  { %v690_v61 = vmul.f32 %v2255_v49, %v1785_v60  ;;  %v678_v20 = vpop.f32.mrb[11].mxu0  ;;  %v777_v2 = vmax.f32 %v763_v58, 0.0 }
 0x37d   :  { %v776_v62 = vmax.f32 %v758_v59, 0.0  ;;  %v689_v63 = vmul.f32 %v2258_v54, %v678_v20 }
 0x37e   :  { %v773_v5 = vadd.f32 %v2317_v13, %v690_v61 }
 0x37f   :  { %v768_v3 = vadd.f32 %v2321_v11, %v689_v63  ;;  %1800 = vmatprep.mubr.msk.f32.mxu0 %vm504_vm14, %v776_v62 }
 0x380   :  { %1801 = vmatmul.mubr.msk.f32.vlgmr.msra.gmra.mrb[12].mxu0 %vm504_vm14, %v777_v2  ;;  %v779_v46 = vmax.f32 %v773_v5, 0.0 }
 0x381   :  { %v778_v44 = vmax.f32 %v768_v3, 0.0  ;;  %1906 = vmatpush3.bf16.msra.mxu0 %v2155_v18  ;;  %v953_v18 = vpop.xlane.xlu0 %952 }
 0x382   :  { %1826 = vmatprep.subr.mxu0 %v2160_v19  ;;  %vm955_vm2 = vcmp.eq.f32.partialorder %v953_v18, 0.0 }
 0x383   :  { %1803 = vmatprep.mubr.msk.f32.mxu0 %vm504_vm14, %v778_v44  ;;  %v957_v6 = vsel %vm955_vm2, 1.0, %v953_v18 }
 0x384   :  { %1804 = vmatmul.mubr.msk.f32.gmra.mrb[14].mxu0 %vm504_vm14, %v779_v46  ;;  %1959 = vrcp.f32 %v957_v6 }
 0x385   :  { %1827 = vmatpush3.msra.mxu0 %v2160_v19  ;;  %1828 = vmatprep.mubr.msk.f32.mxu0 %vm211_vm0, %v2276_v0  ;;  %1961 = vrcp.f32 %v956_v7 }
 0x388   :  { %1829 = vmatmul.mubr.msk.f32.vlgmr.msra.gmra.mrb[16].mxu0 %vm211_vm0, %v2285_v1 }
 0x389   :  { %1842 = vmatprep.mubr.msk.f32.mxu0 %vm504_vm14, %v940_v41 }
 0x38c   :  { %v1821_v49 = vpop.f32.mrb[14].mxu1 }
 0x38d   :  { %v1123_v54 = vpop.f32.mrb[15].mxu1 }
 0x38e   :  { %v1960_v0 = vpop.eup %1959 }
 0x38f   :  { %v1962_v8 = vpop.eup %1961  ;;  %v1133_v9 = vmul.f32 %v1960_v0, %v1821_v49 }
 0x390   :  { %v1132_v13 = vmul.f32 %v1962_v8, %v1123_v54 }
 0x453   :  { %v1802_v10 = vpop.f32.mrb[12].mxu0 }
 0x454   :  { %880 = vst.msk [vmem:[#allocation2 + $0x8] sm:$0xff] %vm309_vm12, %v1802_v10  ;;  %v860_v19 = vpop.f32.mrb[13].mxu0 }
 0x455   :  { %879 = vst.msk [vmem:[#allocation2] sm:$0xff] %vm309_vm12, %v860_v19 }
 0x457   :  { %v1805_v1 = vpop.f32.mrb[14].mxu0 }
 0x458   :  { %882 = vst.msk [vmem:[#allocation2 + $0x18] sm:$0xff] %vm309_vm12, %v1805_v1  ;;  %v870_v12 = vpop.f32.mrb[15].mxu0 }
 0x459   :  { %881 = vst.msk [vmem:[#allocation2 + $0x10] sm:$0xff] %vm309_vm12, %v870_v12 }
 0x45b   :  { %v1830_v11 = vpop.f32.mrb[16].mxu0 }
 0x45c   :  { %v1206_v14 = vadd.f32 %v1830_v11, %v1133_v9  ;;  %v1200_v15 = vpop.f32.mrb[17].mxu0 }
 0x45d   :  { %v1201_v16 = vadd.f32 %v1200_v15, %v1132_v13 }
 0x45e   :  { %v1210_v23 = vmax.f32 %v1206_v14, 0.0 }
 0x45f   :  { %v1209_v21 = vmax.f32 %v1201_v16, 0.0 }
 0x461   :  { %1835 = vmatprep.mubr.msk.f32.mxu1 %vm504_vm14, %v1209_v21 }
 0x462   :  { %1836 = vmatmul.mubr.msk.f32.vlgmr.msra.gmra.mrb[16].mxu1 %vm504_vm14, %v1210_v23 }
 0x463   :  { %1918 = vmatpush3.bf16.msra.mxu1 %v2247_v35  ;;  %1849 = vmatprep.mubr.msk.f32.mxu1 %vm504_vm14, %v1209_v21  ;;  %v1451_v35 = vld [vmem:[%s2439_s9 + $0x8] sm:$0xff] }
 0x464   :  { %v1919_v28 = vpack.c.bf16 %v1451_v35, %v1450_v27 }
 0x466   :  { %1850 = vmatmul.mubr.msk.f32.vlgmr.msra.gmra.mrb[18].mxu1 %vm504_vm14, %v1210_v23 }
 0x535   :  { %v1837_v17 = vpop.f32.mrb[16].mxu1 }
 0x536   :  { %v1287_v25 = vpop.f32.mrb[17].mxu1 }
 0x537   :  { %v1911_v22 = vpack.c.bf16 %v1837_v17, %v1287_v25 }
 0x539   :  { %1912 = vmatprep.subr.bf16.mxu0 %v1911_v22  ;;  %v1851_v26 = vpop.f32.mrb[18].mxu1 }
 0x53a   :  { %1914 = vmatpush3.bf16.msra.mxu0 %v1911_v22  ;;  %v1439_v24 = vpop.f32.mrb[19].mxu1 }
 0x53b   :  { %1920 = vmatprep.subr.bf16.mxu0 %v1919_v28 }
 0x53d   :  { %1843 = vmatmul.mubr.msk.f32.vlgmr.msra.gmra.mrb[18].mxu0 %vm504_vm14, %v2343_v45 }
 0x53e   :  { %1922 = vmatpush3.bf16.msra.mxu0 %v1919_v28 }
 0x610   :  { %v1844_v31 = vpop.f32.mrb[18].mxu0 }
 0x611   :  { %v1372_v32 = vmul.f32 %v1960_v0, %v1844_v31  ;;  %v1362_v33 = vpop.f32.mrb[19].mxu0 }
 0x612   :  { %v1371_v34 = vmul.f32 %v1962_v8, %v1362_v33 }
 0x613   :  { %v1445_v36 = vadd.f32 %v1851_v26, %v1372_v32 }
 0x614   :  { %v1440_v37 = vadd.f32 %v1439_v24, %v1371_v34 }
 0x615   :  { %v1449_v39 = vmax.f32 %v1445_v36, 0.0 }
 0x616   :  { %v1448_v38 = vmax.f32 %v1440_v37, 0.0 }
 0x618   :  { %1856 = vmatprep.mubr.msk.f32.mxu0 %vm504_vm14, %v1448_v38 }
 0x619   :  { %1857 = vmatmul.mubr.msk.f32.vlgmr.msra.gmra.mrb[20].mxu0 %vm504_vm14, %v1449_v39 }
 0x61a   :  { %1974 = shalt.err (!%p1971_p4)
}
 0x61b   :  { %s1975_s4 = scalar_lea.hbm %s2441_s11, 512 }
 0x61c   :  { %p1976_p5 = scmp.ne.s32.totalorder %s2441_s11, %s1975_s4  ;;  %p1979_p6 = scmp.lt.u32.totalorder %s1975_s4, %s2441_s11 }
 0x61e   :  { %p1981_p7 = pnand %p1979_p6, %p1976_p5 }
 0x620   :  { %1984 = shalt.err (!%p1981_p7)
}
 0x621   :  { %s2017_s5 = smov 128   ;;  %s2018_s15 = smov 8   ;;  %v1643_v40 = vld [vmem:[%s2440_s10] ss:$0 sm:$0xff] }
 0x622   :  { %1552 = dma.vmem_to_hbm [thread:$0]  %s1547_s27, 512, %s2441_s11, [#allocation3], %s2017_s5, %s2017_s5, %s2018_s15  }
 0x623   :  { %s2019_s18 = smov [#allocation4]  }
 0x624   :  { %s1558_s19 = sshll.u32 %s2019_s18, 4  ;;  %s1559_s19 = int_to_ptr.vmem [resolvable:$true] %s1558_s19 }
 0x625   :  { %s1985_s20 = scalar_lea.vmem %s1559_s19, 256  ;;  %p1990_p9 = scmp.lt.s32.totalorder %s1559_s19, %s1559_s19 }
 0x626   :  { %p1986_p8 = scmp.ne.s32.totalorder %s1559_s19, %s1985_s20  ;;  %p1991_p10 = scmp.lt.s32.totalorder %s1985_s20, %s1985_s20 }
 0x628   :  { %p1992_p11 = por %p1991_p10, %p1990_p9 }
 0x62a   :  { %p1993_p12 = pnand %p1992_p11, %p1986_p8 }
 0x6ec   :  { %v1858_v41 = vpop.f32.mrb[20].mxu0 }
 0x6ed   :  { %v1536_v42 = vadd.f32 %v1858_v41, %v1643_v40  ;;  %v1530_v43 = vpop.f32.mrb[21].mxu0 }
 0x6ee   :  { %v1531_v45 = vadd.f32 %v1643_v40, %v1530_v43 }
 0x6ef   :  { %1540 = vst.msk [vmem:[#allocation4 + $0x8] sm:$0xff] %vm309_vm12, %v1536_v42 }
 0x6f0   :  { %1539 = vst.msk [vmem:[#allocation4] sm:$0xff] %vm309_vm12, %v1531_v45 }
 0x6f1   :  { %1996 = shalt.err (!%p1993_p12)
}
 0x6f2   :  { %s1997_s21 = scalar_lea.hbm %s2442_s12, 256 }
 0x6f3   :  { %p1998_p13 = scmp.ne.s32.totalorder %s2442_s12, %s1997_s21  ;;  %p2001_p0 = scmp.lt.u32.totalorder %s1997_s21, %s2442_s12 }
 0x6f5   :  { %p2003_p1 = pnand %p2001_p0, %p1998_p13 }
 0x6f7   :  { %2006 = shalt.err (!%p2003_p1)
}
 0x6f8   :  { %1564 = dma.vmem_to_hbm [thread:$0]  %s1559_s19, 256, %s2442_s12, [#allocation5], %s2017_s5, %s2017_s5, %s2018_s15  }
 0x6f9   :  { %2007 = dma.done.wait [#allocation3], 512  }
 0x6fa   :  { %2008 = vsyncadd [#allocation3], 4294966784 }
 0x6fb   :  { %2009 = dma.done.wait [#allocation5], 256  }
 0x6fc   :  { %2010 = vsyncadd [#allocation5], 4294967040 }
 0x6fd   :  { %1571 = vsyncpa [#allocation3], 1 }
 0x6fe   :  { %1572 = vsyncpa [#allocation5], 1 }

</bundles_post_ra>
